<compile_context>
chip_gen: v7x
topology: tpu7x:2x2x1
jax: 0.10.0
libtpu: 0.0.40
codegen_flags: <defaults>
</compile_context>

<pallas_src>
import jax
import jax.numpy as jnp
from jax.experimental import pallas as pl
from jax.experimental.pallas import tpu as pltpu


def _round_up(n, m):
    return ((n + m - 1) // m) * m


def bernoulli_encoder_ln_kernel(f_ref, a_ref, b_ref, c_ref, out_ref):
    # f_ref: (TB, 1) = log(x), precomputed f32; a/b/c: (1, TN) f32; out: (TB, TN)
    f = f_ref[...]
    a = a_ref[...]
    b = b_ref[...]
    c = c_ref[...]
    # Horner form of a*f^2 + b*f + c (broadcast outer product, VPU only —
    # the K=1 "matmuls" of the reference never touch the MXU).
    out_ref[...] = ((a * f + b) * f + c).astype(out_ref.dtype)


def bernoulli_encoder_ln(x, cs, log_sigmas, As, *,
                         tile_b=1024, max_tile_n=2048,
                         out_dtype=jnp.float32,
                         vmem_limit_bytes=48 * 1024 * 1024):
    """Forward pass of BernoulliEncoderLN. x: (B, 1); cs/log_sigmas/As: (1, N)."""
    B = x.shape[0]
    N = cs.shape[1]
    SUB, LANE = 8, 128

    # ---- hoisted parameter math and log(x) (tiny, done once, not per tile) ----
    cs32 = cs.astype(jnp.float32)
    inv_sig = 0.5 * jnp.exp(-2.0 * log_sigmas.astype(jnp.float32))   # (1, N)
    a = -inv_sig                                                     # (1, N)
    b = 2.0 * cs32 * inv_sig                                         # (1, N)
    c = -(cs32 * cs32) * inv_sig + jnp.log(As.astype(jnp.float32))   # (1, N)
    f = jnp.log(x.astype(jnp.float32))                               # (B, 1)

    # ---- batch tile: evenly split B, 8-aligned, never overshooting ~2x ----
    num_b_tiles = max(1, pl.cdiv(B, tile_b))
    tb = _round_up(pl.cdiv(B, num_b_tiles), SUB)
    if tb >= B:
        tb = B                         # single full-extent block (always legal)

    # ---- feature tile: lane-aligned, <= max_tile_n; ragged edge is masked ----
    tn = min(_round_up(max_tile_n, LANE), _round_up(N, LANE))
    if tn >= N:
        tn = N                         # single full-extent block (always legal)

    # ---- v7x megacore: make sure >= 2 blocks exist along a parallel axis ----
    if pl.cdiv(B, tb) * pl.cdiv(N, tn) < 2:
        if tb > SUB:
            tb = _round_up(pl.cdiv(tb, 2), SUB)      # 8-aligned -> legal block
        elif tn > LANE:
            tn = _round_up(tn // 2, LANE)            # 128-aligned -> legal block

    grid = (pl.cdiv(B, tb), pl.cdiv(N, tn))
    param_spec = pl.BlockSpec((1, tn), lambda i, j: (0, j))

    out = pl.pallas_call(
        bernoulli_encoder_ln_kernel,
        out_shape=jax.ShapeDtypeStruct((B, N), out_dtype),   # exact shape: no slice copy
        grid_spec=pltpu.PrefetchScalarGridSpec(
            num_scalar_prefetch=0,
            grid=grid,
            in_specs=[
                pl.BlockSpec((tb, 1), lambda i, j: (i, 0)),   # f = log(x)
                param_spec,                                   # a
                param_spec,                                   # b
                param_spec,                                   # c
            ],
            out_specs=pl.BlockSpec((tb, tn), lambda i, j: (i, j)),
        ),
        compiler_params=pltpu.CompilerParams(
            dimension_semantics=("parallel", "parallel"),
            vmem_limit_bytes=vmem_limit_bytes,
        ),
    )(f, a, b, c)
    return out


def reference(x, cs, log_sigmas, As):
    f_x = jnp.log(x)
    inv_sigmas = 0.5 * jnp.exp(-2.0 * log_sigmas)
    etas1 = -(f_x ** 2) @ inv_sigmas
    etas2 = 2.0 * f_x @ (cs * inv_sigmas)
    etas3 = -(cs ** 2) * inv_sigmas + jnp.log(As)
    return etas1 + etas2 + etas3


def make_params(N, x_min, x_max, w=1.0):
    # Deterministic stand-in for the kmeans-based init:
    # centers evenly spaced in log-space over [log(x_min), log(x_max)].
    # TODO(synk): sklearn KMeans init replaced with deterministic linspace centers.
    centers = jnp.linspace(jnp.log(x_min), jnp.log(x_max), N)        # sorted (N,)
    cs = centers[None, :].astype(jnp.float32)                        # (1, N)
    deltac = jnp.diff(centers)                                       # (N-1,)
    deltac = jnp.concatenate([deltac, deltac[-1:]])                  # (N,)
    log_sigmas = jnp.log(jnp.sqrt(w * deltac))[None, :].astype(jnp.float32)  # (1, N)
    As = jnp.ones((1, N), dtype=jnp.float32)                         # (1, N)
    return cs, log_sigmas, As


if __name__ == "__main__":
    B, N = 16, 32
    x_min, x_max = 0.1, 10.0

    key = jax.random.PRNGKey(0)
    # x must be positive (log is taken); shape (B, 1) as implied by (1, N) params.
    x = jax.random.uniform(key, (B, 1), dtype=jnp.float32,
                           minval=x_min, maxval=x_max)

    cs, log_sigmas, As = make_params(N, x_min, x_max, w=1.0)

    out = bernoulli_encoder_ln(x, cs, log_sigmas, As)
    out = jax.block_until_ready(out)

    with jax.default_matmul_precision("highest"):
        ref = reference(x, cs, log_sigmas, As)

    assert out.shape == (B, N)
    err = jnp.max(jnp.abs(out - ref))
    assert jnp.allclose(out, ref, atol=1e-4, rtol=1e-4), f"max abs err = {err}"

    print("KERNEL_OK")
</pallas_src>

<mosaic_0001>
module attributes {stable_mosaic.version = 11 : i64} {
  func.func @bernoulli_encoder_ln_kernel(%arg0: i32, %arg1: i32, %arg2: memref<8x1xf32, #tpu.memory_space<vmem>>, %arg3: memref<1x32xf32, #tpu.memory_space<vmem>>, %arg4: memref<1x32xf32, #tpu.memory_space<vmem>>, %arg5: memref<1x32xf32, #tpu.memory_space<vmem>>, %arg6: memref<8x32xf32, #tpu.memory_space<vmem>>) attributes {dimension_semantics = [#tpu.dimension_semantics<parallel>, #tpu.dimension_semantics<parallel>], iteration_bounds = array<i64: 2, 1>, scalar_prefetch = 0 : i64, scratch_operands = 0 : i64, tpu.core_type = #tpu.core_type<tc>, window_params = [{transform_indices = @transform_0, window_bounds = array<i64: 8, 1>}, {transform_indices = @transform_1, window_bounds = array<i64: 1, 32>}, {transform_indices = @transform_2, window_bounds = array<i64: 1, 32>}, {transform_indices = @transform_3, window_bounds = array<i64: 1, 32>}, {transform_indices = @transform_4, window_bounds = array<i64: 8, 32>}]} {
    %c0 = arith.constant 0 : index
    %c0_0 = arith.constant 0 : index
    %0 = vector.load %arg2[%c0, %c0_0] : memref<8x1xf32, #tpu.memory_space<vmem>>, vector<8x1xf32>
    %c0_1 = arith.constant 0 : index
    %c0_2 = arith.constant 0 : index
    %1 = vector.load %arg3[%c0_1, %c0_2] : memref<1x32xf32, #tpu.memory_space<vmem>>, vector<1x32xf32>
    %c0_3 = arith.constant 0 : index
    %c0_4 = arith.constant 0 : index
    %2 = vector.load %arg4[%c0_3, %c0_4] : memref<1x32xf32, #tpu.memory_space<vmem>>, vector<1x32xf32>
    %c0_5 = arith.constant 0 : index
    %c0_6 = arith.constant 0 : index
    %3 = vector.load %arg5[%c0_5, %c0_6] : memref<1x32xf32, #tpu.memory_space<vmem>>, vector<1x32xf32>
    %4 = vector.broadcast %1 : vector<1x32xf32> to vector<8x32xf32>
    %5 = vector.broadcast %0 : vector<8x1xf32> to vector<8x32xf32>
    %6 = arith.mulf %4, %5 : vector<8x32xf32>
    %7 = vector.broadcast %2 : vector<1x32xf32> to vector<8x32xf32>
    %8 = arith.addf %6, %7 : vector<8x32xf32>
    %9 = vector.broadcast %0 : vector<8x1xf32> to vector<8x32xf32>
    %10 = arith.mulf %8, %9 : vector<8x32xf32>
    %11 = vector.broadcast %3 : vector<1x32xf32> to vector<8x32xf32>
    %12 = arith.addf %10, %11 : vector<8x32xf32>
    %c0_7 = arith.constant 0 : index
    %c0_8 = arith.constant 0 : index
    %13 = vector.load %arg6[%c0_7, %c0_8] : memref<8x32xf32, #tpu.memory_space<vmem>>, vector<8x32xf32>
    tpu.vector_store %arg6[%c0_7, %c0_8], %12 {strides = array<i32>} : memref<8x32xf32, #tpu.memory_space<vmem>>, vector<8x32xf32>,
    return
  }
  func.func @transform_0(%arg0: i32, %arg1: i32) -> (i32, i32) {
    %c0_i32 = arith.constant 0 : i32
    %c0_i32_0 = arith.constant 0 : i32
    return %arg0, %c0_i32 : i32, i32
  }
  func.func @transform_1(%arg0: i32, %arg1: i32) -> (i32, i32) {
    %c0_i32 = arith.constant 0 : i32
    %c0_i32_0 = arith.constant 0 : i32
    return %c0_i32, %arg1 : i32, i32
  }
  func.func @transform_2(%arg0: i32, %arg1: i32) -> (i32, i32) {
    %c0_i32 = arith.constant 0 : i32
    %c0_i32_0 = arith.constant 0 : i32
    return %c0_i32, %arg1 : i32, i32
  }
  func.func @transform_3(%arg0: i32, %arg1: i32) -> (i32, i32) {
    %c0_i32 = arith.constant 0 : i32
    %c0_i32_0 = arith.constant 0 : i32
    return %c0_i32, %arg1 : i32, i32
  }
  func.func @transform_4(%arg0: i32, %arg1: i32) -> (i32, i32) {
    %c0_i32 = arith.constant 0 : i32
    return %arg0, %arg1 : i32, i32
  }
}

</mosaic_0001>

<bundles_post_ra>
// kernel: tpu_custom_call.1
= control target key start
LH: loop header
LB: loop body
LE: loop exit
PB: predicated region body
PF: predicated region fallthrough
CT: control target
= control target key end

     0   :  { %9 = vsyncpa [#allocation3], 0  ;;  %s703_s0 = inlined_call_operand.vmem [shape: f32[16,1], index: 0, kind: input, shape index: {}]   ;;  %s704_s1 = inlined_call_operand.vmem [shape: f32[1,32], index: 1, kind: input, shape index: {}]   ;;  %s705_s2 = inlined_call_operand.vmem [shape: f32[1,32], index: 2, kind: input, shape index: {}]   ;;  %s706_s3 = inlined_call_operand.vmem [shape: f32[1,32], index: 3, kind: input, shape index: {}]   ;;  %s707_s4 = inlined_call_operand.hbm [shape: f32[16,32], index: 4, kind: output, shape index: {}]  }
   0x1   :  { %11 = vsyncpa [#allocation3 + $0x1], 0  ;;  %s582_s15 = smov 0   ;;  %s584_s16 = smov 0  }
   0x2   :  { %s586_s17 = smov 0   ;;  %s588_s18 = smov 0  }
   0x3   :  { %s590_s19 = smov 0   ;;  %s592_s20 = smov 0  }
   0x4 LB: > { %s401_s21 = sadd.s32 4294967295, %s553_s20   ;;  %s402_s22 = sadd.s32 4294967294, %s553_s20   ;;  %s553_s20 = sphi %s592_s20, %s17_s20   ;;  %s549_s19 = sphi %s590_s19, %s714_s19   ;;  %s545_s18 = sphi %s588_s18, %s713_s18   ;;  %s541_s17 = sphi %s586_s17, %s712_s17   ;;  %s537_s16 = sphi %s584_s16, %s711_s16   ;;  %s533_s15 = sphi %s582_s15, %s710_s15  }
   0x5   : > { %s29_s23 = sadd.s32 1, %s549_s19  ;;  %s142_s24 = sadd.s32 1, %s541_s17 }
   0x6   : > { %p31_p0 = scmp.ge.s32.totalorder %s29_s23, 2  ;;  %p152_p1 = scmp.ne.s32.totalorder %s541_s17, %s537_s16 }
   0x7   : > { %p153_p2 = scmp.eq.s32.totalorder %s401_s21, 1  ;;  %p158_p3 = scmp.ne.s32.totalorder %s537_s16, %s533_s15 }
   0x8   : > { %s716_s23 = smov (%p31_p0, %s29_s23), 0  ;;  %p159_p5 = scmp.eq.s32.totalorder %s402_s22, 1 }
   0x9   : > { %p622_p4 = por %p153_p2, %p152_p1  ;;  %s137_s26 = ssub.s32 %s549_s19, %s716_s23 }
   0xa   : > { %p408_p6 = scmp.ge.s32.totalorder %s553_s20, 1  ;;  %p140_p7 = scmp.eq.s32.totalorder %s137_s26, 0 }
   0xb   : > { %p629_p8 = por %p159_p5, %p158_p3  ;;  %p202_p9 = scmp.lt.s32.totalorder %s553_s20, 3 }
   0xc   : > { %s635_s28 = scalar_select %p140_p7, %s541_s17, %s142_s24  }
   0xd   : > { %p203_p10 = pnand %p408_p6, %p202_p9 }
   0xe   : > { %p236_p11 = scmp.lt.s32.totalorder (!%p203_p10), %s545_s18, 1  ;;  %v555_v0 = vmov (!%p203_p10), 0   ;;  %s233_s8 = sand.u32 (!%p203_p10), 1, %s537_s16   ;;  %v411_v2 = vld [vmem:[%s704_s1] ss:$0 sm:$0xff] (!%p203_p10)  ;;  %vm280_vm0 = vcmask (!%p203_p10), 261120  }
   0xf   : > { %206 = sbr.rel (%p203_p10) target bundleno = 177 (0xb1), region = 36  ;;  %474 = vset.pattern.permute.xlu0 (!%p203_p10), %v555_v0  ;;  %s409_s11 = sshll.u32 (!%p203_p10), %s233_s8, 3  ;;  %v412_v3 = vld [vmem:[%s705_s2] ss:$0 sm:$0xff] (!%p203_p10) }
  0x10   : > { %v413_v7 = vld [vmem:[%s706_s3] ss:$0 sm:$0xff] (!%p203_p10)  ;;  %s415_s22 = sshll.u32 (!%p203_p10), %s545_s18, 7  ;;  %s235_s24 = scalar_lea.vmem (!%p203_p10), [#allocation2], %s409_s11 }
  0x11   : > { %s297_s26 = sshll.u32 (!%p203_p10), %s235_s24, 4  ;;  %s656_s5 = scalar_lea.hbm (!%p203_p10), %s707_s4, %s415_s22  ;;  %s658_s26 = int_to_ptr.vmem [resolvable:$true] %s297_s26 }
  0x12   : > { %s283_s6 = scalar_lea.sflag (!%p203_p10), [#allocation3], %s233_s8 }
  0x16   : > { %s237_s29 = scalar_select %p236_p11, %s545_s18, 1 }
  0x17   : > { %s556_s18 = smov [#allocation2]  }
  0x18   : > { %s410_s30 = sshll.u32 %s237_s29, 3  ;;  %s479_s9 = sshll.u32 %s556_s18, 4  ;;  %s480_s9 = int_to_ptr.vmem [resolvable:$false] %s479_s9 }
  0x19   : > { %s239_s7 = scalar_lea.vmem %s703_s0, %s410_s30  ;;  %s481_s10 = scalar_lea.vmem %s480_s9, 256 }
  0x1a   : > { %v249_v1 = vld [vmem:[%s239_s7] sm:$0xff]  ;;  %s475_s7 = scalar_lea.vmem %s658_s26, 128  ;;  %p482_p1 = scmp.lt.s32.totalorder %s658_s26, %s480_s9 }
  0x1b   : > { %261 = vperm.xlu0 %474, %v249_v1   ;;  %p476_p12 = scmp.ne.s32.totalorder %s658_s26, %s475_s7  ;;  %p483_p2 = scmp.lt.s32.totalorder %s481_s10, %s475_s7 }
  0x1d   : > { %p477_p13 = pnand %p476_p12, %p622_p4  ;;  %p484_p3 = por %p483_p2, %p482_p1 }
  0x1f   : > { %p478_p0 = pneg %p477_p13 }
  0x21   : > { %p485_p5 = pnand %p484_p3, %p478_p0 }
  0x9a   : > { %v262_v4 = vpop.permute.xlu0 %261 }
  0x9b   : > { %v264_v5 = vmul.f32 %v411_v2, %v262_v4 }
  0x9d   : > { %v271_v6 = vadd.f32 %v412_v3, %v264_v5 }
  0x9f   : > { %v272_v8 = vmul.f32 %v271_v6, %v262_v4 }
  0xa1   : > { %v279_v9 = vadd.f32 %v413_v7, %v272_v8 }
  0xa3   : > { %281 = vst.msk [vmem:[%s235_s24] sm:$0xff] %vm280_vm0, %v279_v9 }
  0xa4   : > { %488 = shalt.err (!%p485_p5)
}
  0xa5   : > { %s489_s8 = scalar_lea.hbm %s656_s5, 128  ;;  %s493_s13 = scalar_lea.hbm %s707_s4, 256 }
  0xa6   : > { %p490_p6 = scmp.ne.s32.totalorder %s656_s5, %s489_s8  ;;  %p494_p10 = scmp.lt.u32.totalorder %s656_s5, %s707_s4 }
  0xa7   : > { %p495_p11 = scmp.lt.u32.totalorder %s493_s13, %s489_s8  ;;  %p497_p13 = scmp.lt.u32.totalorder %s489_s8, %s656_s5 }
  0xa8   : > { %p491_p7 = pnand %p490_p6, %p622_p4 }
  0xa9   : > { %p496_p12 = por %p495_p11, %p494_p10 }
  0xaa   : > { %p492_p9 = pneg %p491_p7 }
  0xab   : > { %p498_p0 = por %p497_p13, %p496_p12 }
  0xad   : > { %p499_p1 = pnand %p498_p0, %p492_p9 }
  0xaf   : > { %502 = shalt.err (!%p499_p1)
}
  0xb0   : > { %418 = dma.vmem_to_hbm [thread:$0]  (%p622_p4), %s658_s26, 128, %s656_s5, %s283_s6  }
  0xb1 PF: > { %p424_p2 = scmp.ge.s32.totalorder %s553_s20, 2  ;;  %s309_s22 = sand.u32 1, %s533_s15  }
  0xb2   : > { %s310_s24 = scalar_lea.sflag [#allocation3], %s309_s22 }
  0xb3   : > { %p421_p3 = pnand %p424_p2, %p629_p8 }
  0xb5   : > { %528 = dma.done.wait (!%p421_p3), %s310_s24, 128  }
  0xb6   : > { %530 = vsyncadd (!%p421_p3), %s310_s24, 4294967168  ;;  %s17_s20 = sadd.s32 1, %s553_s20   ;;  %s710_s15 = smov %s537_s16 }
  0xb7   : > { %p14_p5 = scmp.ge.s32.totalorder %s17_s20, 4   ;;  %s711_s16 = smov %s541_s17 }
  0xb8   : > { %s712_s17 = smov %s635_s28  ;;  %s713_s18 = smov %s549_s19 }
  0xb9   : > { %s714_s19 = smov %s716_s23  ;;  %16 = sbr.rel (!%p14_p5) target bundleno = 4 (0x4), region = 80 }
  0xc0   :  { %315 = vsyncpa [#allocation3], 1 }
  0xc1   :  { %317 = vsyncpa [#allocation3 + $0x1], 1 }

</bundles_post_ra>
